<compile_context>
chip_gen: v7x
topology: tpu7x:2x2x1
jax: 0.10.0
libtpu: 0.0.40
codegen_flags: <defaults>
</compile_context>

<pallas_src>
import jax
import jax.numpy as jnp
from jax import lax
from jax.experimental import pallas as pl
from jax.experimental.pallas import tpu as pltpu

# ----- problem sizes (small, consistent with the module's forward) -----
B, C, L = 2, 4, 128          # batch, map_channels, signal length
D = C * L                    # flattened saliency size
D_HALF = (C // 2) * L        # map_channels // 2 channels, flattened
H = 32                       # classifier hidden width
K = 8                        # number of classes

OUT_W = 128                  # lane-dense output width (logits cols 0..K-1, N_1 col K)
N_FUSED = 128                # fused RHS width (W2 in cols 0..K-1, detectors in K..K+2)

# MXU-operand dtype.  jnp.bfloat16 halves the dominant W1/x DMA bytes on
# v5e/v6e and feeds the MXU natively (f32 accumulation is preserved via
# preferred_element_type; all elementwise math stays f32).  Left at f32 here
# so the check against the exact-f32 reference stays bit-tight.
MATMUL_DTYPE = jnp.float32


def c3d_kernel(x_ref, w1_ref, bias_ref, wf_ref, out_ref):
    # x: (TB, D)  w1: (D, H)  bias: (2, 128)  wf: (H, 128)  out: (TB, 128)
    x = x_ref[...]
    wf = wf_ref[...]
    b1 = bias_ref[0:1, :H]          # (1, H)   classifier hidden bias
    bf = bias_ref[1:2, :]           # (1, 128) fused output/detector biases

    # ---- classifier hidden: h = tanh(x @ W1 + b1)  (elementwise in f32) ----
    h = jnp.tanh(jnp.dot(x, w1_ref[...],
                         preferred_element_type=jnp.float32) + b1)      # (TB, H)

    # ---- two MXU pushes against ONE fused (H, 128) RHS ----
    # cols 0..K-1 of wf = W2 (classifier); cols K..K+2 = detector heads already
    # folded through W1^T and the d(sum logits)/dh chain-rule factor.
    cls_slab = jnp.dot(h.astype(wf.dtype), wf,
                       preferred_element_type=jnp.float32) + bf          # (TB, 128)
    det_slab = jnp.dot((1.0 - h * h).astype(wf.dtype), wf,
                       preferred_element_type=jnp.float32) + bf          # (TB, 128)

    # ---- max classifier logit (mask the padding lanes) ----
    col = lax.broadcasted_iota(jnp.int32, (cls_slab.shape[0], OUT_W), 1)
    maxcls = jnp.max(jnp.where(col < K, cls_slab, -jnp.inf),
                     axis=1, keepdims=True)                              # (TB, 1)

    # ---- adversarial score selection (exact tie-break semantics) ----
    a = det_slab[:, K:K + 1]                                             # (TB, 1)
    b = det_slab[:, K + 1:K + 2]
    c = det_slab[:, K + 2:K + 3]
    is_adv = (jnp.where(jnp.logical_and(a > b, a > c), a, 0.0)
              + jnp.where(jnp.logical_and(b >= a, b > c), b, 0.0)
              + jnp.where(jnp.logical_and(c >= a, c >= b), c, 0.0))      # (TB, 1)
    n1 = (is_adv + 1.0) * maxcls                                         # (TB, 1)

    # ---- single lane-dense store: logits in cols 0..K-1, N_1 in col K ----
    out = jnp.where(col < K, cls_slab, 0.0)
    out = jnp.where(col == K, n1, out)        # n1 broadcast into column K
    out_ref[...] = out.astype(out_ref.dtype)


def make_params(key):
    ks = jax.random.split(key, 8)
    p = {}
    p["w1"] = jax.random.normal(ks[0], (D, H), jnp.float32) / jnp.sqrt(D)
    p["b1"] = jax.random.normal(ks[1], (1, H), jnp.float32) * 0.01
    p["w2"] = jax.random.normal(ks[2], (H, K), jnp.float32) / jnp.sqrt(H)
    p["b2"] = jax.random.normal(ks[3], (1, K), jnp.float32) * 0.01
    p["wd1"] = jax.random.normal(ks[4], (D_HALF, 2), jnp.float32) / jnp.sqrt(D_HALF)
    p["bd1"] = jnp.zeros((1, 2), jnp.float32)
    p["wd2"] = jax.random.normal(ks[5], (D_HALF, 2), jnp.float32) / jnp.sqrt(D_HALF)
    p["bd2"] = jnp.zeros((1, 2), jnp.float32)
    p["wd3"] = jax.random.normal(ks[6], (D, 2), jnp.float32) / jnp.sqrt(D)
    p["bd3"] = jnp.zeros((1, 2), jnp.float32)
    return p


def c3d_forward(x, p, *, tile_b=None):
    b_in = x.shape[0]
    x_flat = x.reshape(b_in, D)

    # batch as a real (parallel) grid axis; pad rows to the tile.
    if tile_b is None:
        tile_b = 128 if b_in >= 128 else 8
    b_pad = pl.cdiv(b_in, tile_b) * tile_b
    x_pad = jnp.zeros((b_pad, D), MATMUL_DTYPE).at[:b_in].set(
        x_flat.astype(MATMUL_DTYPE))

    # ---- host-side algebraic fusion (parameter-only, done once) ----
    # sal = ((1 - h^2) * rowsum(W2)) @ W1^T and the detector heads only use
    # column 0 of a linear map of sal, so fold everything parameter-only
    # through W1^T here:
    w2s = jnp.sum(p["w2"], axis=1)                                   # (H,)
    wd1f = p["w1"][:D_HALF].T @ p["wd1"][:, 0]                       # (H,)
    wd2f = p["w1"][D_HALF:].T @ p["wd2"][:, 0]                       # (H,)
    wd3f = p["w1"].T @ p["wd3"][:, 0]                                # (H,)
    det_cols = jnp.stack([wd1f, wd2f, wd3f], axis=1) * w2s[:, None]  # (H, 3)

    w_fused = (jnp.zeros((H, N_FUSED), jnp.float32)
               .at[:, :K].set(p["w2"])
               .at[:, K:K + 3].set(det_cols)).astype(MATMUL_DTYPE)

    b_fused = (jnp.zeros((N_FUSED,), jnp.float32)
               .at[:K].set(p["b2"][0])
               .at[K].set(p["bd1"][0, 0])
               .at[K + 1].set(p["bd2"][0, 0])
               .at[K + 2].set(p["bd3"][0, 0]))
    bias_pack = (jnp.zeros((2, N_FUSED), jnp.float32)
                 .at[0, :H].set(p["b1"][0])
                 .at[1, :].set(b_fused))

    w1 = p["w1"].astype(MATMUL_DTYPE)

    out = pl.pallas_call(
        c3d_kernel,
        out_shape=jax.ShapeDtypeStruct((b_pad, OUT_W), jnp.float32),
        grid=(b_pad // tile_b,),
        in_specs=[
            pl.BlockSpec((tile_b, D), lambda i: (i, 0)),      # x tile
            pl.BlockSpec((D, H), lambda i: (0, 0)),           # W1 (broadcast)
            pl.BlockSpec((2, N_FUSED), lambda i: (0, 0)),     # packed biases
            pl.BlockSpec((H, N_FUSED), lambda i: (0, 0)),     # fused RHS
        ],
        out_specs=pl.BlockSpec((tile_b, OUT_W), lambda i: (i, 0)),
        compiler_params=pltpu.CompilerParams(
            dimension_semantics=("parallel",)),
    )(x_pad, w1, bias_pack, w_fused)

    # torch.cat([classifier_output, N_1.unsqueeze(1)], 1) == cols 0..K of slab
    return out[:b_in, :K + 1]


def c3d_reference(x, p):
    xf = x.reshape(x.shape[0], D)

    def classifier(z):
        return jnp.tanh(z @ p["w1"] + p["b1"]) @ p["w2"] + p["b2"]

    logits = classifier(xf)
    sal = jax.grad(lambda z: jnp.sum(classifier(z)))(xf)
    a = (sal[:, :D_HALF] @ p["wd1"] + p["bd1"])[:, 0]
    b = (sal[:, D_HALF:] @ p["wd2"] + p["bd2"])[:, 0]
    c = (sal @ p["wd3"] + p["bd3"])[:, 0]
    is_adv = (a * ((a > b) & (a > c)).astype(jnp.float32)
              + b * ((b >= a) & (b > c)).astype(jnp.float32)
              + c * ((c >= a) & (c >= b)).astype(jnp.float32))
    n1 = (is_adv + 1.0) * jnp.max(logits, axis=1)
    return jnp.concatenate([logits, n1[:, None]], axis=1)


if __name__ == "__main__":
    key = jax.random.PRNGKey(0)
    kx, kp = jax.random.split(key)
    x = jax.random.normal(kx, (B, C, L), jnp.float32)
    params = make_params(kp)

    out = jax.block_until_ready(c3d_forward(x, params))
    ref = jax.block_until_ready(c3d_reference(x, params))

    assert out.shape == (B, K + 1), out.shape
    assert jnp.allclose(out, ref, rtol=1e-3, atol=1e-3), (out, ref)
    print("KERNEL_OK")
</pallas_src>

<mosaic_0001>
module attributes {stable_mosaic.version = 11 : i64} {
  func.func @c3d_kernel(%arg0: i32, %arg1: memref<8x512xf32, #tpu.memory_space<vmem>>, %arg2: memref<512x32xf32, #tpu.memory_space<vmem>>, %arg3: memref<2x128xf32, #tpu.memory_space<vmem>>, %arg4: memref<32x128xf32, #tpu.memory_space<vmem>>, %arg5: memref<8x128xf32, #tpu.memory_space<vmem>>) attributes {dimension_semantics = [#tpu.dimension_semantics<parallel>], iteration_bounds = array<i64: 1>, scalar_prefetch = 0 : i64, scratch_operands = 0 : i64, tpu.core_type = #tpu.core_type<tc>, window_params = [{transform_indices = @transform_0, window_bounds = array<i64: 8, 512>}, {pipeline_mode = #tpu.pipeline_mode<synchronous>, transform_indices = @transform_1, window_bounds = array<i64: 512, 32>}, {pipeline_mode = #tpu.pipeline_mode<synchronous>, transform_indices = @transform_2, window_bounds = array<i64: 2, 128>}, {pipeline_mode = #tpu.pipeline_mode<synchronous>, transform_indices = @transform_3, window_bounds = array<i64: 32, 128>}, {transform_indices = @transform_4, window_bounds = array<i64: 8, 128>}]} {
    %c0 = arith.constant 0 : index
    %c0_0 = arith.constant 0 : index
    %0 = vector.load %arg1[%c0, %c0_0] : memref<8x512xf32, #tpu.memory_space<vmem>>, vector<8x512xf32>
    %c0_1 = arith.constant 0 : index
    %c0_2 = arith.constant 0 : index
    %1 = vector.load %arg4[%c0_1, %c0_2] : memref<32x128xf32, #tpu.memory_space<vmem>>, vector<32x128xf32>
    %c0_3 = arith.constant 0 : index
    %c0_4 = arith.constant 0 : index
    %2 = vector.load %arg3[%c0_3, %c0_4] : memref<2x128xf32, #tpu.memory_space<vmem>>, vector<1x32xf32>
    %c1 = arith.constant 1 : index
    %c0_5 = arith.constant 0 : index
    %3 = vector.load %arg3[%c1, %c0_5] : memref<2x128xf32, #tpu.memory_space<vmem>>, vector<1x128xf32>
    %c0_6 = arith.constant 0 : index
    %c0_7 = arith.constant 0 : index
    %4 = vector.load %arg2[%c0_6, %c0_7] : memref<512x32xf32, #tpu.memory_space<vmem>>, vector<512x32xf32>
    %cst = arith.constant dense<0.000000e+00> : vector<8x32xf32>
    %5 = tpu.matmul %0, %4, %cst {dimension_numbers = #tpu.dot_dimension_numbers<[1], [0], [0], [1], [0, 0, 1, 1], [], []>} : vector<8x512xf32>, vector<512x32xf32>, vector<8x32xf32> -> vector<8x32xf32>
    %6 = vector.broadcast %2 : vector<1x32xf32> to vector<8x32xf32>
    %7 = arith.addf %5, %6 : vector<8x32xf32>
    %8 = math.tanh %7 : vector<8x32xf32>
    %cst_8 = arith.constant dense<0.000000e+00> : vector<8x128xf32>
    %9 = tpu.matmul %8, %1, %cst_8 {dimension_numbers = #tpu.dot_dimension_numbers<[1], [0], [0], [1], [0, 0, 1, 1], [], []>} : vector<8x32xf32>, vector<32x128xf32>, vector<8x128xf32> -> vector<8x128xf32>
    %10 = vector.broadcast %3 : vector<1x128xf32> to vector<8x128xf32>
    %11 = arith.addf %9, %10 : vector<8x128xf32>
    %12 = arith.mulf %8, %8 : vector<8x32xf32>
    %cst_9 = arith.constant 1.000000e+00 : f32
    %13 = vector.broadcast %cst_9 : f32 to vector<8x32xf32>
    %14 = arith.subf %13, %12 : vector<8x32xf32>
    %cst_10 = arith.constant dense<0.000000e+00> : vector<8x128xf32>
    %15 = tpu.matmul %14, %1, %cst_10 {dimension_numbers = #tpu.dot_dimension_numbers<[1], [0], [0], [1], [0, 0, 1, 1], [], []>} : vector<8x32xf32>, vector<32x128xf32>, vector<8x128xf32> -> vector<8x128xf32>
    %16 = vector.broadcast %3 : vector<1x128xf32> to vector<8x128xf32>
    %17 = arith.addf %15, %16 : vector<8x128xf32>
    %18 = tpu.iota {dimensions = array<i32: 1>} : vector<8x128xi32>
    %c8_i32 = arith.constant 8 : i32
    %19 = vector.broadcast %c8_i32 : i32 to vector<8x128xi32>
    %20 = arith.cmpi slt, %18, %19 : vector<8x128xi32>
    %cst_11 = arith.constant 0xFF800000 : f32
    %21 = vector.broadcast %cst_11 : f32 to vector<8x128xf32>
    %22 = arith.select %20, %11, %21 : vector<8x128xi1>, vector<8x128xf32>
    %cst_12 = arith.constant dense<0xFF800000> : vector<8xf32>
    %23 = vector.multi_reduction <maximumf>, %22, %cst_12 [1] : vector<8x128xf32> to vector<8xf32>
    %24 = vector.shape_cast %23 : vector<8xf32> to vector<8x1xf32>
    %25 = vector.extract_strided_slice %17 {offsets = [0, 8], sizes = [8, 1], strides = [1, 1]} : vector<8x128xf32> to vector<8x1xf32>
    %26 = vector.extract_strided_slice %17 {offsets = [0, 9], sizes = [8, 1], strides = [1, 1]} : vector<8x128xf32> to vector<8x1xf32>
    %27 = vector.extract_strided_slice %17 {offsets = [0, 10], sizes = [8, 1], strides = [1, 1]} : vector<8x128xf32> to vector<8x1xf32>
    %28 = arith.cmpf ogt, %25, %26 : vector<8x1xf32>
    %29 = arith.cmpf ogt, %25, %27 : vector<8x1xf32>
    %30 = arith.andi %28, %29 : vector<8x1xi1>
    %cst_13 = arith.constant 0.000000e+00 : f32
    %31 = vector.broadcast %cst_13 : f32 to vector<8x1xf32>
    %32 = arith.select %30, %25, %31 : vector<8x1xi1>, vector<8x1xf32>
    %33 = arith.cmpf oge, %26, %25 : vector<8x1xf32>
    %34 = arith.cmpf ogt, %26, %27 : vector<8x1xf32>
    %35 = arith.andi %33, %34 : vector<8x1xi1>
    %cst_14 = arith.constant 0.000000e+00 : f32
    %36 = vector.broadcast %cst_14 : f32 to vector<8x1xf32>
    %37 = arith.select %35, %26, %36 : vector<8x1xi1>, vector<8x1xf32>
    %38 = arith.addf %32, %37 : vector<8x1xf32>
    %39 = arith.cmpf oge, %27, %25 : vector<8x1xf32>
    %40 = arith.cmpf oge, %27, %26 : vector<8x1xf32>
    %41 = arith.andi %39, %40 : vector<8x1xi1>
    %cst_15 = arith.constant 0.000000e+00 : f32
    %42 = vector.broadcast %cst_15 : f32 to vector<8x1xf32>
    %43 = arith.select %41, %27, %42 : vector<8x1xi1>, vector<8x1xf32>
    %44 = arith.addf %38, %43 : vector<8x1xf32>
    %cst_16 = arith.constant 1.000000e+00 : f32
    %45 = vector.broadcast %cst_16 : f32 to vector<8x1xf32>
    %46 = arith.addf %44, %45 : vector<8x1xf32>
    %47 = arith.mulf %46, %24 : vector<8x1xf32>
    %c8_i32_17 = arith.constant 8 : i32
    %48 = vector.broadcast %c8_i32_17 : i32 to vector<8x128xi32>
    %49 = arith.cmpi slt, %18, %48 : vector<8x128xi32>
    %cst_18 = arith.constant 0.000000e+00 : f32
    %50 = vector.broadcast %cst_18 : f32 to vector<8x128xf32>
    %51 = arith.select %49, %11, %50 : vector<8x128xi1>, vector<8x128xf32>
    %c8_i32_19 = arith.constant 8 : i32
    %52 = vector.broadcast %c8_i32_19 : i32 to vector<8x128xi32>
    %53 = arith.cmpi eq, %18, %52 : vector<8x128xi32>
    %54 = vector.shape_cast %47 : vector<8x1xf32> to vector<8x1xf32>
    %55 = vector.broadcast %54 : vector<8x1xf32> to vector<8x128xf32>
    %56 = arith.select %53, %55, %51 : vector<8x128xi1>, vector<8x128xf32>
    %c0_20 = arith.constant 0 : index
    %c0_21 = arith.constant 0 : index
    %57 = vector.load %arg5[%c0_20, %c0_21] : memref<8x128xf32, #tpu.memory_space<vmem>>, vector<8x128xf32>
    tpu.vector_store %arg5[%c0_20, %c0_21], %56 {strides = array<i32>} : memref<8x128xf32, #tpu.memory_space<vmem>>, vector<8x128xf32>,
    return
  }
  func.func @transform_0(%arg0: i32) -> (i32, i32) {
    %c0_i32 = arith.constant 0 : i32
    %c0_i32_0 = arith.constant 0 : i32
    return %arg0, %c0_i32 : i32, i32
  }
  func.func @transform_1(%arg0: i32) -> (i32, i32) {
    %c0_i32 = arith.constant 0 : i32
    %c0_i32_0 = arith.constant 0 : i32
    %c0_i32_1 = arith.constant 0 : i32
    return %c0_i32, %c0_i32_0 : i32, i32
  }
  func.func @transform_2(%arg0: i32) -> (i32, i32) {
    %c0_i32 = arith.constant 0 : i32
    %c0_i32_0 = arith.constant 0 : i32
    %c0_i32_1 = arith.constant 0 : i32
    return %c0_i32, %c0_i32_0 : i32, i32
  }
  func.func @transform_3(%arg0: i32) -> (i32, i32) {
    %c0_i32 = arith.constant 0 : i32
    %c0_i32_0 = arith.constant 0 : i32
    %c0_i32_1 = arith.constant 0 : i32
    return %c0_i32, %c0_i32_0 : i32, i32
  }
  func.func @transform_4(%arg0: i32) -> (i32, i32) {
    %c0_i32 = arith.constant 0 : i32
    %c0_i32_0 = arith.constant 0 : i32
    return %arg0, %c0_i32 : i32, i32
  }
}

</mosaic_0001>

<bundles_post_ra>
// kernel: tpu_custom_call.1
= control target key start
LH: loop header
LB: loop body
LE: loop exit
PB: predicated region body
PF: predicated region fallthrough
CT: control target
= control target key end

     0   :  { %s940_s0 = inlined_call_operand.vmem [shape: f32[8,512], index: 0, kind: input, shape index: {}]   ;;  %s941_s1 = inlined_call_operand.vmem [shape: f32[512,32], index: 1, kind: input, shape index: {}]   ;;  %s942_s2 = inlined_call_operand.vmem [shape: f32[2,128], index: 2, kind: input, shape index: {}]   ;;  %s943_s3 = inlined_call_operand.vmem [shape: f32[32,128], index: 3, kind: input, shape index: {}]   ;;  %s944_s4 = inlined_call_operand.hbm [shape: f32[8,128], index: 4, kind: output, shape index: {}]  }
   0x1   :  { %v44_v0 = vld [vmem:[%s941_s1 + $0x80] sm:$0xff]  ;;  %v45_v1 = vld [vmem:[%s941_s1 + $0x88] sm:$0xff]  ;;  %v46_v11 = vld [vmem:[%s941_s1 + $0x90] sm:$0xff] }
   0x2   :  { %v28_v2 = vld [vmem:[%s941_s1] sm:$0xff]  ;;  %v560_v3 = vpack.c.bf16 %v45_v1, %v44_v0  ;;  %v29_v4 = vld [vmem:[%s941_s1 + $0x8] sm:$0xff]  ;;  %v47_v13 = vld [vmem:[%s941_s1 + $0x98] sm:$0xff] }
   0x3   :  { %v76_v5 = vld [vmem:[%s941_s1 + $0x180] sm:$0xff]  ;;  %v77_v6 = vld [vmem:[%s941_s1 + $0x188] sm:$0xff]  ;;  %v562_v7 = vpack.c.bf16 %v29_v4, %v28_v2  ;;  %v30_v14 = vld [vmem:[%s941_s1 + $0x10] sm:$0xff]  ;;  %v564_v16 = vpack.c.bf16 %v47_v13, %v46_v11 }
   0x4   :  { %v592_v8 = vpack.c.bf16 %v77_v6, %v76_v5  ;;  %v60_v9 = vld [vmem:[%s941_s1 + $0x100] sm:$0xff]  ;;  %v61_v10 = vld [vmem:[%s941_s1 + $0x108] sm:$0xff]  ;;  %561 = vmatprep.subr.bf16.mxu0 %v560_v3  ;;  %v31_v15 = vld [vmem:[%s941_s1 + $0x18] sm:$0xff] }
   0x5   :  { %v594_v12 = vpack.c.bf16 %v61_v10, %v60_v9  ;;  %563 = vmatpush3.bf16.msra.mxu0 %v562_v7  ;;  %v566_v17 = vpack.c.bf16 %v31_v15, %v30_v14  ;;  %v78_v18 = vld [vmem:[%s941_s1 + $0x190] sm:$0xff]  ;;  %v79_v19 = vld [vmem:[%s941_s1 + $0x198] sm:$0xff]  ;;  %v48_v23 = vld [vmem:[%s941_s1 + $0xa0] sm:$0xff] }
   0x6   :  { %593 = vmatprep.subr.bf16.mxu1 %v592_v8  ;;  %v62_v20 = vld [vmem:[%s941_s1 + $0x110] sm:$0xff]  ;;  %v596_v21 = vpack.c.bf16 %v79_v19, %v78_v18  ;;  %v63_v22 = vld [vmem:[%s941_s1 + $0x118] sm:$0xff]  ;;  %v49_v24 = vld [vmem:[%s941_s1 + $0xa8] sm:$0xff]  ;;  %565 = vmatprep.subr.bf16.mxu0 %v564_v16 }
   0x7   :  { %595 = vmatpush3.bf16.msra.mxu1 %v594_v12  ;;  %v598_v25 = vpack.c.bf16 %v63_v22, %v62_v20  ;;  %v568_v26 = vpack.c.bf16 %v49_v24, %v48_v23  ;;  %v32_v27 = vld [vmem:[%s941_s1 + $0x20] sm:$0xff]  ;;  %v33_v28 = vld [vmem:[%s941_s1 + $0x28] sm:$0xff]  ;;  %v50_v35 = vld [vmem:[%s941_s1 + $0xb0] sm:$0xff] }
   0x8   :  { %v80_v29 = vld [vmem:[%s941_s1 + $0x1a0] sm:$0xff]  ;;  %597 = vmatprep.subr.bf16.mxu1 %v596_v21  ;;  %v81_v30 = vld [vmem:[%s941_s1 + $0x1a8] sm:$0xff]  ;;  %v570_v33 = vpack.c.bf16 %v33_v28, %v32_v27  ;;  %v51_v36 = vld [vmem:[%s941_s1 + $0xb8] sm:$0xff] }
   0x9   :  { %v64_v31 = vld [vmem:[%s941_s1 + $0x120] sm:$0xff]  ;;  %v65_v32 = vld [vmem:[%s941_s1 + $0x128] sm:$0xff]  ;;  %567 = vmatpush3.bf16.msra.mxu0 %v566_v17  ;;  %v600_v34 = vpack.c.bf16 %v81_v30, %v80_v29  ;;  %v34_v37 = vld [vmem:[%s941_s1 + $0x30] sm:$0xff]  ;;  %v572_v39 = vpack.c.bf16 %v51_v36, %v50_v35 }
   0xa   :  { %569 = vmatprep.subr.bf16.mxu0 %v568_v26  ;;  %v602_v38 = vpack.c.bf16 %v65_v32, %v64_v31  ;;  %v35_v40 = vld [vmem:[%s941_s1 + $0x38] sm:$0xff]  ;;  %v82_v41 = vld [vmem:[%s941_s1 + $0x1b0] sm:$0xff]  ;;  %v52_v46 = vld [vmem:[%s941_s1 + $0xc0] sm:$0xff] }
   0xb   :  { %599 = vmatpush3.bf16.msra.mxu1 %v598_v25  ;;  %v83_v42 = vld [vmem:[%s941_s1 + $0x1b8] sm:$0xff]  ;;  %v66_v44 = vld [vmem:[%s941_s1 + $0x130] sm:$0xff]  ;;  %v53_v47 = vld [vmem:[%s941_s1 + $0xc8] sm:$0xff]  ;;  %v574_v48 = vpack.c.bf16 %v35_v40, %v34_v37 }
   0xc   :  { %601 = vmatprep.subr.bf16.mxu1 %v600_v34  ;;  %v604_v43 = vpack.c.bf16 %v83_v42, %v82_v41  ;;  %v67_v45 = vld [vmem:[%s941_s1 + $0x138] sm:$0xff]  ;;  %v84_v49 = vld [vmem:[%s941_s1 + $0x1c0] sm:$0xff]  ;;  %v85_v50 = vld [vmem:[%s941_s1 + $0x1c8] sm:$0xff]  ;;  %v576_v52 = vpack.c.bf16 %v53_v47, %v52_v46 }
   0xd   :  { %571 = vmatpush3.bf16.msra.mxu0 %v570_v33  ;;  %v606_v51 = vpack.c.bf16 %v67_v45, %v66_v44  ;;  %v36_v53 = vld [vmem:[%s941_s1 + $0x40] sm:$0xff]  ;;  %v37_v54 = vld [vmem:[%s941_s1 + $0x48] sm:$0xff]  ;;  %v608_v56 = vpack.c.bf16 %v85_v50, %v84_v49  ;;  %v54_v58 = vld [vmem:[%s941_s1 + $0xd0] sm:$0xff] }
   0xe   :  { %573 = vmatprep.subr.bf16.mxu0 %v572_v39  ;;  %v68_v55 = vld [vmem:[%s941_s1 + $0x140] sm:$0xff]  ;;  %v69_v57 = vld [vmem:[%s941_s1 + $0x148] sm:$0xff]  ;;  %v55_v59 = vld [vmem:[%s941_s1 + $0xd8] sm:$0xff]  ;;  %v578_v62 = vpack.c.bf16 %v37_v54, %v36_v53 }
   0xf   :  { %603 = vmatpush3.bf16.msra.mxu1 %v602_v38  ;;  %v86_v60 = vld [vmem:[%s941_s1 + $0x1d0] sm:$0xff]  ;;  %v87_v61 = vld [vmem:[%s941_s1 + $0x1d8] sm:$0xff]  ;;  %v610_v63 = vpack.c.bf16 %v69_v57, %v68_v55  ;;  %v580_v0 = vpack.c.bf16 %v55_v59, %v54_v58  ;;  %v56_v6 = vld [vmem:[%s941_s1 + $0xe0] sm:$0xff] }
  0x10   :  { %605 = vmatprep.subr.bf16.mxu1 %v604_v43  ;;  %v38_v1 = vld [vmem:[%s941_s1 + $0x50] sm:$0xff]  ;;  %v39_v2 = vld [vmem:[%s941_s1 + $0x58] sm:$0xff]  ;;  %v612_v4 = vpack.c.bf16 %v87_v61, %v86_v60  ;;  %v57_v7 = vld [vmem:[%s941_s1 + $0xe8] sm:$0xff] }
  0x11   :  { %575 = vmatpush3.bf16.msra.mxu0 %v574_v48  ;;  %v70_v3 = vld [vmem:[%s941_s1 + $0x150] sm:$0xff]  ;;  %v71_v5 = vld [vmem:[%s941_s1 + $0x158] sm:$0xff]  ;;  %v88_v8 = vld [vmem:[%s941_s1 + $0x1e0] sm:$0xff]  ;;  %v582_v10 = vpack.c.bf16 %v39_v2, %v38_v1  ;;  %v584_v15 = vpack.c.bf16 %v57_v7, %v56_v6 }
  0x12   :  { %577 = vmatprep.subr.bf16.mxu0 %v576_v52  ;;  %v89_v9 = vld [vmem:[%s941_s1 + $0x1e8] sm:$0xff]  ;;  %v40_v11 = vld [vmem:[%s941_s1 + $0x60] sm:$0xff]  ;;  %v614_v14 = vpack.c.bf16 %v71_v5, %v70_v3  ;;  %v58_v17 = vld [vmem:[%s941_s1 + $0xf0] sm:$0xff] }
  0x13   :  { %607 = vmatpush3.bf16.msra.mxu1 %v606_v51  ;;  %v41_v12 = vld [vmem:[%s941_s1 + $0x68] sm:$0xff]  ;;  %v72_v13 = vld [vmem:[%s941_s1 + $0x160] sm:$0xff]  ;;  %v616_v19 = vpack.c.bf16 %v89_v9, %v88_v8  ;;  %v59_v20 = vld [vmem:[%s941_s1 + $0xf8] sm:$0xff] }
  0x14   :  { %609 = vmatprep.subr.bf16.mxu1 %v608_v56  ;;  %v73_v16 = vld [vmem:[%s941_s1 + $0x168] sm:$0xff]  ;;  %v21_v21 = vld [vmem:[%s940_s0 + $0x18] sm:$0xff] }
  0x15   :  { %579 = vmatpush3.bf16.msra.mxu0 %v578_v62  ;;  %v19_v18 = vld [vmem:[%s940_s0 + $0x8] sm:$0xff] }
  0x16   :  { %581 = vmatprep.subr.bf16.mxu0 %v580_v0  ;;  %160 = vmatprep.mubr.f32.mxu0 %v19_v18 }
  0x17   :  { %611 = vmatpush3.bf16.msra.mxu1 %v610_v63 }
  0x18   :  { %613 = vmatprep.subr.bf16.mxu1 %v612_v4 }
  0x19   :  { %9 = vsyncpa [#allocation3], 0  ;;  %v90_v22 = vld [vmem:[%s941_s1 + $0x1f0] sm:$0xff]  ;;  %v91_v23 = vld [vmem:[%s941_s1 + $0x1f8] sm:$0xff]  ;;  %230 = vmatprep.mubr.f32.mxu1 %v21_v21  ;;  %583 = vmatpush3.bf16.msra.mxu0 %v582_v10  ;;  %v586_v24 = vpack.c.bf16 %v41_v12, %v40_v11  ;;  %v618_v25 = vpack.c.bf16 %v73_v16, %v72_v13  ;;  %v588_v26 = vpack.c.bf16 %v59_v20, %v58_v17  ;;  %v672_v39 = vmov 0.0|0.0   ;;  %s675_s30 = smov 2  }
  0x1a   :  { %585 = vmatprep.subr.bf16.mxu0 %v584_v15  ;;  %v42_v27 = vld [vmem:[%s941_s1 + $0x70] sm:$0xff]  ;;  %v43_v28 = vld [vmem:[%s941_s1 + $0x78] sm:$0xff]  ;;  %v620_v29 = vpack.c.bf16 %v91_v23, %v90_v22  ;;  %v18_v34 = vld [vmem:[%s940_s0] sm:$0xff]  ;;  %vm673_vm0 = vmmov 0   ;;  %v674_v42 = vmov 0.0   ;;  %vm241_vm1 = vcmask 261120  }
  0x1b   :  { %615 = vmatpush3.bf16.msra.mxu1 %v614_v14  ;;  %v74_v30 = vld [vmem:[%s941_s1 + $0x170] sm:$0xff]  ;;  %v75_v31 = vld [vmem:[%s941_s1 + $0x178] sm:$0xff]  ;;  %v590_v32 = vpack.c.bf16 %v43_v28, %v42_v27  ;;  %v22_v36 = vld [vmem:[%s943_s3] sm:$0xff]  ;;  %v390_v56 = vlaneseq  ;;  %s676_s5 = smov 127   ;;  %s677_s6 = smov 1   ;;  %v679_v6 = vmov 8  }
  0x1c   :  { %617 = vmatprep.subr.bf16.mxu1 %v616_v19  ;;  %v622_v33 = vpack.c.bf16 %v75_v31, %v74_v30  ;;  %v20_v35 = vld [vmem:[%s940_s0 + $0x10] sm:$0xff]  ;;  %v23_v37 = vld [vmem:[%s943_s3 + $0x8] sm:$0xff]  ;;  %v25_v41 = vld [vmem:[%s943_s3 + $0x18] sm:$0xff]  ;;  %s678_s7 = smov 126   ;;  %645 = vset.pattern.permute.xlu0 %v679_v6 }
  0x1d   :  { %587 = vmatpush3.bf16.msra.mxu0 %v586_v24  ;;  %v24_v38 = vld [vmem:[%s943_s3 + $0x10] sm:$0xff]  ;;  %v625_v40 = vpack.c.bf16 %v23_v37, %v22_v36  ;;  %v454_v45 = vld [vmem:[%s942_s2] ss:$0 sm:$0xff]  ;;  %v391_v57 = vand.u32 127, %v390_v56  ;;  %v455_v58 = vld [vmem:[%s942_s2 + $0x1] ss:$0 sm:$0xff] }
  0x1e   :  { %589 = vmatprep.subr.bf16.mxu0 %v588_v26  ;;  %v628_v43 = vpack.c.bf16 %v25_v41, %v24_v38  ;;  %s680_s2 = smov [#allocation2]  }
  0x1f   :  { %619 = vmatpush3.bf16.msra.mxu1 %v618_v25  ;;  %vm392_vm2 = vcmp.lt.s32.totalorder %v391_v57, 8  ;;  %s446_s8 = sshll.u32 %s680_s2, 4  ;;  %vm432_vm10 = vcmp.eq.s32.totalorder %v391_v57, 8  ;;  %s447_s8 = int_to_ptr.vmem [resolvable:$true] %s446_s8 }
  0x20   :  { %621 = vmatprep.subr.bf16.mxu1 %v620_v29  ;;  %s648_s9 = scalar_lea.vmem %s447_s8, 128  ;;  %p653_p1 = scmp.lt.s32.totalorder %s447_s8, %s447_s8 }
  0x21   :  { %591 = vmatpush3.bf16.msra.mxu0 %v590_v32  ;;  %p649_p0 = scmp.ne.s32.totalorder %s447_s8, %s648_s9  ;;  %p654_p2 = scmp.lt.s32.totalorder %s648_s9, %s648_s9 }
  0x22   :  { %624 = vmatprep.subr.bf16.mxu0 %v672_v39 }
  0x23   :  { %623 = vmatpush3.bf16.msra.mxu1 %v622_v33  ;;  %p655_p3 = por %p654_p2, %p653_p1 }
  0x24   :  { %161 = vmatmul.mubr.f32.vlgmr.msra.gmra.mrb[0].mxu0 %v18_v34  ;;  %630 = vmatprep.subr.bf16.mxu1 %v672_v39 }
  0x25   :  { %546 = vmatprep.mubr.msk.f32.mxu0 %vm673_vm0, %v674_v42  ;;  %626 = vmatpush3.bf16.msra.mxu0 %v625_v40  ;;  %p656_p4 = pnand %p655_p3, %p649_p0 }
  0x26   :  { %231 = vmatmul.mubr.f32.vlgmr.msra.gmra.mrb[0].mxu1 %v20_v35  ;;  %627 = vmatprep.subr.bf16.mxu0 %v672_v39 }
  0x27   :  { %557 = vmatprep.mubr.msk.f32.mxu1 %vm673_vm0, %v674_v42  ;;  %632 = vmatpush3.bf16.msra.mxu1 %v625_v40 }
  0x28   :  { %633 = vmatprep.subr.bf16.mxu1 %v672_v39 }
  0x29   :  { %629 = vmatpush3.bf16.msra.mxu0 %v628_v43 }
  0x2b   :  { %635 = vmatpush3.bf16.msra.mxu1 %v628_v43 }
  0xf7   :  { %v490_v44 = vpop.f32.mrb[0].mxu0 }
  0xf8   :  { %v491_v46 = vpop.f32.mrb[1].mxu0 }
  0xf9   :  { %v525_v47 = vpop.f32.mrb[0].mxu1  ;;  %v492_v48 = vadd.f32 %v491_v46, %v490_v44 }
  0xfa   :  { %v526_v49 = vpop.f32.mrb[1].mxu1 }
  0xfb   :  { %v527_v50 = vadd.f32 %v526_v49, %v525_v47  ;;  %v163_v51 = vadd.f32 %v492_v48, %v454_v45 }
  0xfd   :  { %v233_v52 = vadd.f32 %v527_v50, %v163_v51 }
  0xff   :  { %646 = vtanh.f32 %v233_v52 }
 0x109   :  { %v647_v53 = vpop.eup %646 }
 0x10a   :  { %547 = vmatmul.mubr.msk.f32.vlgmr.msra.gmra.mrb[2].mxu0 %vm241_vm1, %v647_v53  ;;  %v315_v54 = vmul.f32 %v647_v53, %v647_v53 }
 0x10c   :  { %v316_v55 = vsub.f32 1.0, %v315_v54 }
 0x10e   :  { %558 = vmatmul.mubr.msk.f32.vlgmr.msra.gmra.mrb[2].mxu1 %vm241_vm1, %v316_v55 }
 0x1dd   :  { %v311_v59 = vpop.f32.mrb[2].mxu0 }
 0x1de   :  { %v312_v60 = vadd.f32 %v455_v58, %v311_v59  ;;  %v548_v61 = vpop.f32.mrb[3].mxu0 }
 0x1e0   :  { %v431_v62 = vsel %vm392_vm2, %v312_v60, 0.0  ;;  %v393_v2 = vsel %vm392_vm2, %v312_v60, -inf }
 0x1e1   :  { %v386_v63 = vpop.f32.mrb[2].mxu1 }
 0x1e2   :  { %v387_v0 = vadd.f32 %v455_v58, %v386_v63  ;;  %v559_v1 = vpop.f32.mrb[3].mxu1 }
 0x1e4   :  { %418 = vrot.lane.b32.xlu1 %v387_v0, %s675_s30  ;;  %397 = vrot.lane.b32.xlu0 %v387_v0, %s676_s5 }
 0x1e8   :  { %407 = vrot.lane.b32.xlu0 %v387_v0, %s677_s6 }
 0x1ec   :  { %401 = vrot.lane.b32.xlu0 %v387_v0, %s678_s7 }
 0x208   :  { %394 = vmax.xlane.f32.xlu1 %v393_v2 }
 0x256   :  { %v398_v3 = vpop.permute.xlu0 %397  ;;  %v419_v4 = vpop.permute.xlu1 %418 }
 0x257   :  { %vm400_vm3 = vcmp.gt.f32.partialorder %v387_v0, %v398_v3  ;;  %vm421_vm6 = vcmp.ge.f32.partialorder %v387_v0, %v419_v4 }
 0x25a   :  { %v408_v5 = vpop.permute.xlu0 %407 }
 0x25b   :  { %vm410_vm4 = vcmp.ge.f32.partialorder %v387_v0, %v408_v5 }
 0x25c   :  { %vm411_vm5 = vmand %vm410_vm4, %vm400_vm3 }
 0x25d   :  { %v412_v7 = vsel %vm411_vm5, %v387_v0, 0.0  ;;  %vm422_vm7 = vmand %vm421_vm6, %vm410_vm4 }
 0x25e   :  { %414 = vrot.lane.b32.xlu0 %v412_v7, %s676_s5  ;;  %v423_v8 = vsel %vm422_vm7, %v387_v0, 0.0  ;;  %v402_v9 = vpop.permute.xlu0 %401 }
 0x25f   :  { %vm404_vm8 = vcmp.gt.f32.partialorder %v387_v0, %v402_v9 }
 0x260   :  { %vm405_vm9 = vmand %vm400_vm3, %vm404_vm8 }
 0x261   :  { %v406_v11 = vsel %vm405_vm9, %v387_v0, 0.0 }
 0x262   :  { %425 = vrot.lane.b32.xlu0 %v423_v8, %s678_s7 }
 0x295   :  { %v395_v16 = vpop.xlane.xlu1 %394 }
 0x2d0   :  { %v415_v10 = vpop.permute.xlu0 %414 }
 0x2d1   :  { %v417_v12 = vadd.f32 %v415_v10, %v406_v11 }
 0x2d4   :  { %v426_v13 = vpop.permute.xlu0 %425 }
 0x2d5   :  { %v428_v14 = vadd.f32 %v426_v13, %v417_v12 }
 0x2d7   :  { %v429_v15 = vadd.f32 1.0, %v428_v14 }
 0x2d9   :  { %v430_v17 = vmul.f32 %v429_v15, %v395_v16 }
 0x2db   :  { %435 = vperm.xlu0 %645, %v430_v17  }
 0x35a   :  { %v436_v18 = vpop.permute.xlu0 %435 }
 0x35b   :  { %v438_v19 = vsel %vm432_vm10, %v436_v18, %v431_v62 }
 0x35c   :  { %439 = vst [vmem:[#allocation2] sm:$0xff] %v438_v19 }
 0x35d   :  { %659 = shalt.err (!%p656_p4)
}
 0x35e   :  { %s660_s12 = scalar_lea.hbm %s944_s4, 128 }
 0x35f   :  { %p661_p5 = scmp.ne.s32.totalorder %s944_s4, %s660_s12  ;;  %p664_p6 = scmp.lt.u32.totalorder %s660_s12, %s944_s4 }
 0x361   :  { %p666_p7 = pnand %p664_p6, %p661_p5 }
 0x363   :  { %669 = shalt.err (!%p666_p7)
}
 0x364   :  { %449 = dma.vmem_to_hbm [thread:$0]  %s447_s8, 128, %s944_s4, [#allocation3]  }
 0x365   :  { %670 = dma.done.wait [#allocation3], 128  }
 0x366   :  { %671 = vsyncadd [#allocation3], 4294967168 }
 0x367   :  { %453 = vsyncpa [#allocation3], 1 }

</bundles_post_ra>
